<compile_context>
chip_gen: v7x
topology: tpu7x:2x2x1
jax: 0.10.0
libtpu: 0.0.40
codegen_flags: <defaults>
</compile_context>

<pallas_src>
import jax
import jax.numpy as jnp
from jax.experimental import pallas as pl
from jax.experimental.pallas import tpu as pltpu

LANE_PAD = 128  # lane-dense padded width for the linear head output


# ----------------------------------------------------------------------------
# Pallas kernel: fused 3x GCN layers + linear head (one graph per grid step)
# ----------------------------------------------------------------------------
def _influence_gnn_kernel(
    a_ref,            # (N, N)       bf16  normalized propagation matrix
    x_ref,            # (N, Cin)     bf16  input node features
    w1_ref, b1_ref,   # (Cin, H) bf16, (1, H) f32
    w2_ref, b2_ref,   # (H, H)   bf16, (1, H) f32
    w3_ref, b3_ref,   # (H, H)   bf16, (1, H) f32
    wl_ref, bl_ref,   # (H, 128) bf16 (zero-padded), (1, 128) f32 (zero-padded)
    o_ref,            # (N, 128)     f32  output (first Cout lanes are real)
):
    a = a_ref[...]                                   # bf16, reused by all layers

    # Hoisted bias loads (JAX does not CSE broadcast_in_dim).
    b1 = b1_ref[...]
    b2 = b2_ref[...]
    b3 = b3_ref[...]
    bl = bl_ref[...]

    # --- GCNConv 1:  (A @ X) @ W1 + b1, then ReLU ----------------------------
    # Reordered (associativity): Cin < H, so the N^2 matmul is Cin-wide.
    ax = jnp.dot(a, x_ref[...], preferred_element_type=jnp.float32)
    h = jnp.dot(ax.astype(jnp.bfloat16), w1_ref[...],
                preferred_element_type=jnp.float32) + b1
    h = jnp.maximum(h, 0.0)
    # dropout(p=0.3) -> identity in eval mode

    # --- GCNConv 2:  A @ (H @ W2) + b2 ---------------------------------------
    hw = jnp.dot(h.astype(jnp.bfloat16), w2_ref[...],
                 preferred_element_type=jnp.float32)
    h = jnp.dot(a, hw.astype(jnp.bfloat16),
                preferred_element_type=jnp.float32) + b2
    h = jnp.maximum(h, 0.0)
    # dropout(p=0.3) -> identity in eval mode

    # --- GCNConv 3 -----------------------------------------------------------
    hw = jnp.dot(h.astype(jnp.bfloat16), w3_ref[...],
                 preferred_element_type=jnp.float32)
    h = jnp.dot(a, hw.astype(jnp.bfloat16),
                preferred_element_type=jnp.float32) + b3
    h = jnp.maximum(h, 0.0)

    # --- Linear head (lane-dense: padded to 128 output lanes) ---------------
    o_ref[...] = (
        jnp.dot(h.astype(jnp.bfloat16), wl_ref[...],
                preferred_element_type=jnp.float32) + bl
    ).astype(o_ref.dtype)


# ----------------------------------------------------------------------------
# Wrapper: batch of graphs -> one pallas_call, grid over the batch.
# ----------------------------------------------------------------------------
def influence_gnn_forward(a_prop, x, params):
    """a_prop: (B, N, N) f32, x: (B, N, Cin) f32 -> (B, N, Cout) f32."""
    B, N, _ = a_prop.shape
    Cin = x.shape[-1]
    H = params["w1"].shape[1]
    Cout = params["wl"].shape[1]
    P = LANE_PAD

    # bf16 MXU operands (accumulation stays f32 inside the kernel).
    a_bf = a_prop.astype(jnp.bfloat16)
    x_bf = x.astype(jnp.bfloat16)
    w1 = params["w1"].astype(jnp.bfloat16)
    w2 = params["w2"].astype(jnp.bfloat16)
    w3 = params["w3"].astype(jnp.bfloat16)
    # Zero-pad the tiny head to a lane-dense 128-wide output.
    wl_p = jnp.zeros((H, P), jnp.bfloat16).at[:, :Cout].set(
        params["wl"].astype(jnp.bfloat16))
    bl_p = jnp.zeros((1, P), jnp.float32).at[:, :Cout].set(params["bl"])

    sq = pl.Squeezed()
    batch_map = lambda b: (b, 0, 0)
    shared_map = lambda b: (0, 0)

    in_specs = [
        pl.BlockSpec((sq, N, N), batch_map),     # A_prop  (per-graph)
        pl.BlockSpec((sq, N, Cin), batch_map),   # X       (per-graph)
        pl.BlockSpec((Cin, H), shared_map),      # w1 (shared -> constant block)
        pl.BlockSpec((1, H), shared_map),        # b1
        pl.BlockSpec((H, H), shared_map),        # w2
        pl.BlockSpec((1, H), shared_map),        # b2
        pl.BlockSpec((H, H), shared_map),        # w3
        pl.BlockSpec((1, H), shared_map),        # b3
        pl.BlockSpec((H, P), shared_map),        # wl (padded)
        pl.BlockSpec((1, P), shared_map),        # bl (padded)
    ]
    out_specs = pl.BlockSpec((sq, N, P), batch_map)

    # Advisory cost estimate (per grid step x B).
    flops_per_graph = 2 * (
        N * N * Cin          # A @ X
        + N * Cin * H        # (AX) @ W1
        + 2 * (N * H * H)    # H @ W2, H @ W3
        + 2 * (N * N * H)    # A @ (.) for layers 2, 3
        + N * H * P          # head
    )
    bytes_accessed = int(
        a_bf.size * 2 + x_bf.size * 2
        + (w1.size + w2.size + w3.size + wl_p.size) * 2
        + (params["b1"].size + params["b2"].size + params["b3"].size
           + bl_p.size) * 4
        + B * N * P * 4
    )

    out_padded = pl.pallas_call(
        _influence_gnn_kernel,
        out_shape=jax.ShapeDtypeStruct((B, N, P), jnp.float32),
        grid=(B,),
        in_specs=in_specs,
        out_specs=out_specs,
        compiler_params=pltpu.CompilerParams(
            dimension_semantics=("parallel",),   # batch across TCs on v7x
            vmem_limit_bytes=64 * 1024 * 1024,
        ),
        cost_estimate=pl.CostEstimate(
            flops=int(B * flops_per_graph),
            transcendentals=0,
            bytes_accessed=bytes_accessed,
        ),
    )(a_bf, x_bf, w1, params["b1"], w2, params["b2"], w3, params["b3"],
      wl_p, bl_p)

    return out_padded[:, :, :Cout]


# ----------------------------------------------------------------------------
# Plain-JAX glue: build the GCN propagation matrix from edge_index/edge_attr
# (PyG gcn_norm semantics: add self loops w=1, symmetric D^-1/2 normalization,
#  aggregate at the target node).
# ----------------------------------------------------------------------------
def build_propagation_matrix(edge_index, edge_weight, num_nodes):
    row = edge_index[0]
    col = edge_index[1]
    adj = jnp.zeros((num_nodes, num_nodes), jnp.float32)
    adj = adj.at[row, col].add(edge_weight.astype(jnp.float32))
    adj = adj + jnp.eye(num_nodes, dtype=jnp.float32)          # self loops, w = 1

    deg = jnp.sum(adj, axis=0)                                  # incoming degree
    deg_inv_sqrt = jnp.where(deg > 0, 1.0 / jnp.sqrt(deg), 0.0)
    hat_a = deg_inv_sqrt[:, None] * adj * deg_inv_sqrt[None, :]
    return hat_a.T                                              # propagation matrix


# ----------------------------------------------------------------------------
# Deterministic parameter init (glorot-ish), matching module shapes.
# ----------------------------------------------------------------------------
def init_params(key, in_channels, hidden_channels, out_channels):
    ks = jax.random.split(key, 4)

    def glorot(k, fan_in, fan_out):
        lim = jnp.sqrt(6.0 / (fan_in + fan_out))
        return jax.random.uniform(
            k, (fan_in, fan_out), jnp.float32, minval=-lim, maxval=lim
        )

    return {
        "w1": glorot(ks[0], in_channels, hidden_channels),
        "b1": jnp.zeros((1, hidden_channels), jnp.float32),
        "w2": glorot(ks[1], hidden_channels, hidden_channels),
        "b2": jnp.zeros((1, hidden_channels), jnp.float32),
        "w3": glorot(ks[2], hidden_channels, hidden_channels),
        "b3": jnp.zeros((1, hidden_channels), jnp.float32),
        "wl": glorot(ks[3], hidden_channels, out_channels),
        "bl": jnp.zeros((1, out_channels), jnp.float32),
    }


# ----------------------------------------------------------------------------
# Pure-JAX reference mirroring the kernel's bf16/accumulation behaviour.
# ----------------------------------------------------------------------------
def reference_forward(a_prop, x, p):
    a = a_prop.astype(jnp.bfloat16)
    xb = x.astype(jnp.bfloat16)
    w1 = p["w1"].astype(jnp.bfloat16)
    w2 = p["w2"].astype(jnp.bfloat16)
    w3 = p["w3"].astype(jnp.bfloat16)
    wl = p["wl"].astype(jnp.bfloat16)

    def one(a_i, x_i):
        ax = jnp.dot(a_i, x_i, preferred_element_type=jnp.float32)
        h = jnp.dot(ax.astype(jnp.bfloat16), w1,
                    preferred_element_type=jnp.float32) + p["b1"]
        h = jnp.maximum(h, 0.0)

        hw = jnp.dot(h.astype(jnp.bfloat16), w2,
                     preferred_element_type=jnp.float32)
        h = jnp.dot(a_i, hw.astype(jnp.bfloat16),
                    preferred_element_type=jnp.float32) + p["b2"]
        h = jnp.maximum(h, 0.0)

        hw = jnp.dot(h.astype(jnp.bfloat16), w3,
                     preferred_element_type=jnp.float32)
        h = jnp.dot(a_i, hw.astype(jnp.bfloat16),
                    preferred_element_type=jnp.float32) + p["b3"]
        h = jnp.maximum(h, 0.0)

        return jnp.dot(h.astype(jnp.bfloat16), wl,
                       preferred_element_type=jnp.float32) + p["bl"]

    return jax.vmap(one)(a, xb)


if __name__ == "__main__":
    key = jax.random.PRNGKey(0)

    # Small synthetic batch of "congress networks".
    batch = 4
    num_nodes = 16
    num_edges = 40
    in_channels = 8
    hidden_channels = 32
    out_channels = 4

    k_param, k_rest = jax.random.split(key)
    params = init_params(k_param, in_channels, hidden_channels, out_channels)

    a_list, x_list = [], []
    graph_keys = jax.random.split(k_rest, batch)
    for gk in graph_keys:
        k_x, k_src, k_dst, k_w = jax.random.split(gk, 4)
        x_g = jax.random.normal(k_x, (num_nodes, in_channels), jnp.float32)
        src = jax.random.randint(k_src, (num_edges,), 0, num_nodes)
        dst = jax.random.randint(k_dst, (num_edges,), 0, num_nodes)
        edge_index = jnp.stack([src, dst], axis=0)                       # (2, E)
        edge_attr = jax.random.uniform(k_w, (num_edges, 1), jnp.float32)  # (E, 1)
        edge_weight = edge_attr.reshape(-1)                               # .view(-1)
        a_list.append(build_propagation_matrix(edge_index, edge_weight, num_nodes))
        x_list.append(x_g)

    a_prop = jnp.stack(a_list, axis=0)   # (B, N, N)
    x = jnp.stack(x_list, axis=0)        # (B, N, Cin)

    out = influence_gnn_forward(a_prop, x, params)
    out = jax.block_until_ready(out)

    ref = reference_forward(a_prop, x, params)
    assert out.shape == (batch, num_nodes, out_channels)
    assert jnp.allclose(out, ref, atol=1e-2, rtol=1e-2), "mismatch vs JAX reference"

    print("KERNEL_OK")
</pallas_src>

<mosaic_0001>
module attributes {stable_mosaic.version = 11 : i64} {
  func.func @_influence_gnn_kernel(%arg0: i32, %arg1: memref<1x16x16xbf16, #tpu.memory_space<vmem>>, %arg2: memref<1x16x8xbf16, #tpu.memory_space<vmem>>, %arg3: memref<8x32xbf16, #tpu.memory_space<vmem>>, %arg4: memref<1x32xf32, #tpu.memory_space<vmem>>, %arg5: memref<32x32xbf16, #tpu.memory_space<vmem>>, %arg6: memref<1x32xf32, #tpu.memory_space<vmem>>, %arg7: memref<32x32xbf16, #tpu.memory_space<vmem>>, %arg8: memref<1x32xf32, #tpu.memory_space<vmem>>, %arg9: memref<32x128xbf16, #tpu.memory_space<vmem>>, %arg10: memref<1x128xf32, #tpu.memory_space<vmem>>, %arg11: memref<1x16x128xf32, #tpu.memory_space<vmem>>) attributes {dimension_semantics = [#tpu.dimension_semantics<parallel>], iteration_bounds = array<i64: 4>, scalar_prefetch = 0 : i64, scratch_operands = 0 : i64, tpu.core_type = #tpu.core_type<tc>, window_params = [{transform_indices = @transform_0, window_bounds = array<i64: 1, 16, 16>}, {transform_indices = @transform_1, window_bounds = array<i64: 1, 16, 8>}, {pipeline_mode = #tpu.pipeline_mode<synchronous>, transform_indices = @transform_2, window_bounds = array<i64: 8, 32>}, {pipeline_mode = #tpu.pipeline_mode<synchronous>, transform_indices = @transform_3, window_bounds = array<i64: 1, 32>}, {pipeline_mode = #tpu.pipeline_mode<synchronous>, transform_indices = @transform_4, window_bounds = array<i64: 32, 32>}, {pipeline_mode = #tpu.pipeline_mode<synchronous>, transform_indices = @transform_5, window_bounds = array<i64: 1, 32>}, {pipeline_mode = #tpu.pipeline_mode<synchronous>, transform_indices = @transform_6, window_bounds = array<i64: 32, 32>}, {pipeline_mode = #tpu.pipeline_mode<synchronous>, transform_indices = @transform_7, window_bounds = array<i64: 1, 32>}, {pipeline_mode = #tpu.pipeline_mode<synchronous>, transform_indices = @transform_8, window_bounds = array<i64: 32, 128>}, {pipeline_mode = #tpu.pipeline_mode<synchronous>, transform_indices = @transform_9, window_bounds = array<i64: 1, 128>}, {transform_indices = @transform_10, window_bounds = array<i64: 1, 16, 128>}]} {
    %c0 = arith.constant 0 : index
    %c0_0 = arith.constant 0 : index
    %c0_1 = arith.constant 0 : index
    %0 = vector.load %arg1[%c0, %c0_0, %c0_1] : memref<1x16x16xbf16, #tpu.memory_space<vmem>>, vector<1x16x16xbf16>
    %1 = vector.shape_cast %0 : vector<1x16x16xbf16> to vector<16x16xbf16>
    %c0_2 = arith.constant 0 : index
    %c0_3 = arith.constant 0 : index
    %2 = vector.load %arg4[%c0_2, %c0_3] : memref<1x32xf32, #tpu.memory_space<vmem>>, vector<1x32xf32>
    %c0_4 = arith.constant 0 : index
    %c0_5 = arith.constant 0 : index
    %3 = vector.load %arg6[%c0_4, %c0_5] : memref<1x32xf32, #tpu.memory_space<vmem>>, vector<1x32xf32>
    %c0_6 = arith.constant 0 : index
    %c0_7 = arith.constant 0 : index
    %4 = vector.load %arg8[%c0_6, %c0_7] : memref<1x32xf32, #tpu.memory_space<vmem>>, vector<1x32xf32>
    %c0_8 = arith.constant 0 : index
    %c0_9 = arith.constant 0 : index
    %5 = vector.load %arg10[%c0_8, %c0_9] : memref<1x128xf32, #tpu.memory_space<vmem>>, vector<1x128xf32>
    %c0_10 = arith.constant 0 : index
    %c0_11 = arith.constant 0 : index
    %c0_12 = arith.constant 0 : index
    %6 = vector.load %arg2[%c0_10, %c0_11, %c0_12] : memref<1x16x8xbf16, #tpu.memory_space<vmem>>, vector<1x16x8xbf16>
    %7 = vector.shape_cast %6 : vector<1x16x8xbf16> to vector<16x8xbf16>
    %cst = arith.constant dense<0.000000e+00> : vector<16x8xf32>
    %8 = tpu.matmul %1, %7, %cst {dimension_numbers = #tpu.dot_dimension_numbers<[1], [0], [0], [1], [0, 0, 1, 1], [], []>} : vector<16x16xbf16>, vector<16x8xbf16>, vector<16x8xf32> -> vector<16x8xf32>
    %9 = arith.truncf %8 : vector<16x8xf32> to vector<16x8xbf16>
    %c0_13 = arith.constant 0 : index
    %c0_14 = arith.constant 0 : index
    %10 = vector.load %arg3[%c0_13, %c0_14] : memref<8x32xbf16, #tpu.memory_space<vmem>>, vector<8x32xbf16>
    %cst_15 = arith.constant dense<0.000000e+00> : vector<16x32xf32>
    %11 = tpu.matmul %9, %10, %cst_15 {dimension_numbers = #tpu.dot_dimension_numbers<[1], [0], [0], [1], [0, 0, 1, 1], [], []>} : vector<16x8xbf16>, vector<8x32xbf16>, vector<16x32xf32> -> vector<16x32xf32>
    %12 = vector.broadcast %2 : vector<1x32xf32> to vector<16x32xf32>
    %13 = arith.addf %11, %12 : vector<16x32xf32>
    %cst_16 = arith.constant 0.000000e+00 : f32
    %14 = vector.broadcast %cst_16 : f32 to vector<16x32xf32>
    %15 = arith.maximumf %13, %14 : vector<16x32xf32>
    %16 = arith.truncf %15 : vector<16x32xf32> to vector<16x32xbf16>
    %c0_17 = arith.constant 0 : index
    %c0_18 = arith.constant 0 : index
    %17 = vector.load %arg5[%c0_17, %c0_18] : memref<32x32xbf16, #tpu.memory_space<vmem>>, vector<32x32xbf16>
    %cst_19 = arith.constant dense<0.000000e+00> : vector<16x32xf32>
    %18 = tpu.matmul %16, %17, %cst_19 {dimension_numbers = #tpu.dot_dimension_numbers<[1], [0], [0], [1], [0, 0, 1, 1], [], []>} : vector<16x32xbf16>, vector<32x32xbf16>, vector<16x32xf32> -> vector<16x32xf32>
    %19 = arith.truncf %18 : vector<16x32xf32> to vector<16x32xbf16>
    %cst_20 = arith.constant dense<0.000000e+00> : vector<16x32xf32>
    %20 = tpu.matmul %1, %19, %cst_20 {dimension_numbers = #tpu.dot_dimension_numbers<[1], [0], [0], [1], [0, 0, 1, 1], [], []>} : vector<16x16xbf16>, vector<16x32xbf16>, vector<16x32xf32> -> vector<16x32xf32>
    %21 = vector.broadcast %3 : vector<1x32xf32> to vector<16x32xf32>
    %22 = arith.addf %20, %21 : vector<16x32xf32>
    %cst_21 = arith.constant 0.000000e+00 : f32
    %23 = vector.broadcast %cst_21 : f32 to vector<16x32xf32>
    %24 = arith.maximumf %22, %23 : vector<16x32xf32>
    %25 = arith.truncf %24 : vector<16x32xf32> to vector<16x32xbf16>
    %c0_22 = arith.constant 0 : index
    %c0_23 = arith.constant 0 : index
    %26 = vector.load %arg7[%c0_22, %c0_23] : memref<32x32xbf16, #tpu.memory_space<vmem>>, vector<32x32xbf16>
    %cst_24 = arith.constant dense<0.000000e+00> : vector<16x32xf32>
    %27 = tpu.matmul %25, %26, %cst_24 {dimension_numbers = #tpu.dot_dimension_numbers<[1], [0], [0], [1], [0, 0, 1, 1], [], []>} : vector<16x32xbf16>, vector<32x32xbf16>, vector<16x32xf32> -> vector<16x32xf32>
    %28 = arith.truncf %27 : vector<16x32xf32> to vector<16x32xbf16>
    %cst_25 = arith.constant dense<0.000000e+00> : vector<16x32xf32>
    %29 = tpu.matmul %1, %28, %cst_25 {dimension_numbers = #tpu.dot_dimension_numbers<[1], [0], [0], [1], [0, 0, 1, 1], [], []>} : vector<16x16xbf16>, vector<16x32xbf16>, vector<16x32xf32> -> vector<16x32xf32>
    %30 = vector.broadcast %4 : vector<1x32xf32> to vector<16x32xf32>
    %31 = arith.addf %29, %30 : vector<16x32xf32>
    %cst_26 = arith.constant 0.000000e+00 : f32
    %32 = vector.broadcast %cst_26 : f32 to vector<16x32xf32>
    %33 = arith.maximumf %31, %32 : vector<16x32xf32>
    %34 = arith.truncf %33 : vector<16x32xf32> to vector<16x32xbf16>
    %c0_27 = arith.constant 0 : index
    %c0_28 = arith.constant 0 : index
    %35 = vector.load %arg9[%c0_27, %c0_28] : memref<32x128xbf16, #tpu.memory_space<vmem>>, vector<32x128xbf16>
    %cst_29 = arith.constant dense<0.000000e+00> : vector<16x128xf32>
    %36 = tpu.matmul %34, %35, %cst_29 {dimension_numbers = #tpu.dot_dimension_numbers<[1], [0], [0], [1], [0, 0, 1, 1], [], []>} : vector<16x32xbf16>, vector<32x128xbf16>, vector<16x128xf32> -> vector<16x128xf32>
    %37 = vector.broadcast %5 : vector<1x128xf32> to vector<16x128xf32>
    %38 = arith.addf %36, %37 : vector<16x128xf32>
    %c0_30 = arith.constant 0 : index
    %c0_31 = arith.constant 0 : index
    %c0_32 = arith.constant 0 : index
    %39 = vector.load %arg11[%c0_30, %c0_31, %c0_32] : memref<1x16x128xf32, #tpu.memory_space<vmem>>, vector<1x16x128xf32>
    %40 = vector.shape_cast %39 : vector<1x16x128xf32> to vector<16x128xf32>
    %41 = vector.shape_cast %38 : vector<16x128xf32> to vector<1x16x128xf32>
    tpu.vector_store %arg11[%c0_30, %c0_31, %c0_32], %41 {strides = array<i32>} : memref<1x16x128xf32, #tpu.memory_space<vmem>>, vector<1x16x128xf32>,
    return
  }
  func.func @transform_0(%arg0: i32) -> (i32, i32, i32) {
    %c0_i32 = arith.constant 0 : i32
    %c0_i32_0 = arith.constant 0 : i32
    %c0_i32_1 = arith.constant 0 : i32
    return %arg0, %c0_i32, %c0_i32_0 : i32, i32, i32
  }
  func.func @transform_1(%arg0: i32) -> (i32, i32, i32) {
    %c0_i32 = arith.constant 0 : i32
    %c0_i32_0 = arith.constant 0 : i32
    %c0_i32_1 = arith.constant 0 : i32
    return %arg0, %c0_i32, %c0_i32_0 : i32, i32, i32
  }
  func.func @transform_2(%arg0: i32) -> (i32, i32) {
    %c0_i32 = arith.constant 0 : i32
    %c0_i32_0 = arith.constant 0 : i32
    %c0_i32_1 = arith.constant 0 : i32
    return %c0_i32, %c0_i32_0 : i32, i32
  }
  func.func @transform_3(%arg0: i32) -> (i32, i32) {
    %c0_i32 = arith.constant 0 : i32
    %c0_i32_0 = arith.constant 0 : i32
    %c0_i32_1 = arith.constant 0 : i32
    return %c0_i32, %c0_i32_0 : i32, i32
  }
  func.func @transform_4(%arg0: i32) -> (i32, i32) {
    %c0_i32 = arith.constant 0 : i32
    %c0_i32_0 = arith.constant 0 : i32
    %c0_i32_1 = arith.constant 0 : i32
    return %c0_i32, %c0_i32_0 : i32, i32
  }
  func.func @transform_5(%arg0: i32) -> (i32, i32) {
    %c0_i32 = arith.constant 0 : i32
    %c0_i32_0 = arith.constant 0 : i32
    %c0_i32_1 = arith.constant 0 : i32
    return %c0_i32, %c0_i32_0 : i32, i32
  }
  func.func @transform_6(%arg0: i32) -> (i32, i32) {
    %c0_i32 = arith.constant 0 : i32
    %c0_i32_0 = arith.constant 0 : i32
    %c0_i32_1 = arith.constant 0 : i32
    return %c0_i32, %c0_i32_0 : i32, i32
  }
  func.func @transform_7(%arg0: i32) -> (i32, i32) {
    %c0_i32 = arith.constant 0 : i32
    %c0_i32_0 = arith.constant 0 : i32
    %c0_i32_1 = arith.constant 0 : i32
    return %c0_i32, %c0_i32_0 : i32, i32
  }
  func.func @transform_8(%arg0: i32) -> (i32, i32) {
    %c0_i32 = arith.constant 0 : i32
    %c0_i32_0 = arith.constant 0 : i32
    %c0_i32_1 = arith.constant 0 : i32
    return %c0_i32, %c0_i32_0 : i32, i32
  }
  func.func @transform_9(%arg0: i32) -> (i32, i32) {
    %c0_i32 = arith.constant 0 : i32
    %c0_i32_0 = arith.constant 0 : i32
    %c0_i32_1 = arith.constant 0 : i32
    return %c0_i32, %c0_i32_0 : i32, i32
  }
  func.func @transform_10(%arg0: i32) -> (i32, i32, i32) {
    %c0_i32 = arith.constant 0 : i32
    %c0_i32_0 = arith.constant 0 : i32
    %c0_i32_1 = arith.constant 0 : i32
    return %arg0, %c0_i32, %c0_i32_0 : i32, i32, i32
  }
}

</mosaic_0001>

<bundles_post_ra>
// kernel: tpu_custom_call.1
= control target key start
LH: loop header
LB: loop body
LE: loop exit
PB: predicated region body
PF: predicated region fallthrough
CT: control target
= control target key end

     0   :  { %s2306_s0 = inlined_call_operand.hbm [shape: bf16[4,16,16], index: 0, kind: input, shape index: {}]   ;;  %s2307_s1 = inlined_call_operand.hbm [shape: bf16[4,16,8], index: 1, kind: input, shape index: {}]   ;;  %s2308_s2 = inlined_call_operand.hbm [shape: bf16[8,32], index: 2, kind: input, shape index: {}]   ;;  %s2309_s3 = inlined_call_operand.hbm [shape: f32[1,32], index: 3, kind: input, shape index: {}]   ;;  %s2310_s4 = inlined_call_operand.hbm [shape: bf16[32,32], index: 4, kind: input, shape index: {}]   ;;  %s2311_s5 = inlined_call_operand.hbm [shape: f32[1,32], index: 5, kind: input, shape index: {}]   ;;  %s2312_s6 = inlined_call_operand.hbm [shape: bf16[32,32], index: 6, kind: input, shape index: {}]   ;;  %s2313_s7 = inlined_call_operand.hbm [shape: f32[1,32], index: 7, kind: input, shape index: {}]   ;;  %s2314_s8 = inlined_call_operand.hbm [shape: bf16[32,128], index: 8, kind: input, shape index: {}]   ;;  %s2315_s9 = inlined_call_operand.hbm [shape: f32[1,128], index: 9, kind: input, shape index: {}]   ;;  %s2316_s10 = inlined_call_operand.hbm [shape: f32[4,16,128], index: 10, kind: output, shape index: {}]  }
   0x1   :  { %2325 = sst [smem:[#allocation28_spill]] %s2306_s0 }
   0x2   :  { %2326 = sst [smem:[#allocation29_spill]] %s2308_s2 }
   0x3   :  { %2327 = sst [smem:[#allocation30_spill]] %s2309_s3 }
   0x4   :  { %2328 = sst [smem:[#allocation31_spill]] %s2310_s4 }
   0x5   :  { %2329 = sst [smem:[#allocation32_spill]] %s2311_s5 }
   0x6   :  { %2330 = sst [smem:[#allocation33_spill]] %s2312_s6 }
   0x7   :  { %2331 = sst [smem:[#allocation34_spill]] %s2316_s10 }
   0x8   :  { %15 = vsyncpa [#allocation3], 0 }
   0x9   :  { %17 = vsyncpa [#allocation3 + $0x1], 0 }
   0xa   :  { %18 = vsyncpa [#allocation6], 0 }
   0xb   :  { %20 = vsyncpa [#allocation6 + $0x1], 0 }
   0xc   :  { %21 = vsyncpa [#allocation9], 0 }
   0xd   :  { %22 = vsyncpa [#allocation12], 0 }
   0xe   :  { %23 = vsyncpa [#allocation15], 0 }
   0xf   :  { %24 = vsyncpa [#allocation18], 0 }
  0x10   :  { %25 = vsyncpa [#allocation4], 0 }
  0x11   :  { %27 = vsyncpa [#allocation4 + $0x1], 0  ;;  %s1841_s13 = smov 0   ;;  %s1843_s14 = smov 0  }
  0x12   :  { %s1845_s15 = smov 0   ;;  %s1847_s16 = smov 0  }
  0x13 LB: > { %s1769_s17 = smov [#allocation7]   ;;  %s1862_s19 = sadd.s32 4294967295, %s1767_s16   ;;  %s1767_s16 = sphi %s1847_s16, %s2366_s16   ;;  %s1763_s15 = sphi %s1845_s15, %s2365_s15   ;;  %s1759_s14 = sphi %s1843_s14, %s2364_s14   ;;  %s1755_s13 = sphi %s1841_s13, %s2363_s13  }
  0x14   : > { %s297_s18 = sshll.u32 %s1769_s17, 4  ;;  %p1127_p0 = scmp.ge.s32.totalorder %s1767_s16, 1  ;;  %s1867_s18 = int_to_ptr.vmem [resolvable:$true] %s297_s18 }
  0x15   : > { %p2318_p1 = scmp.eq.s32.totalorder %s1862_s19, 0  ;;  %p284_p2 = scmp.lt.s32.totalorder %s1767_s16, 5 }
  0x16   : > { %s1770_s21 = smov [#allocation8]   ;;  %s1771_s23 = smov [#allocation11]  }
  0x17   : > { %p1869_p3 = pnand %p1127_p0, %p284_p2  ;;  %s308_s22 = sshll.u32 %s1770_s21, 4  ;;  %s1875_s22 = int_to_ptr.vmem [resolvable:$true] %s308_s22 }
  0x18   : > { %s332_s24 = sshll.u32 %s1771_s23, 4  ;;  %s1772_s26 = smov [#allocation14]   ;;  %s1883_s24 = int_to_ptr.vmem [resolvable:$true] %s332_s24 }
  0x19   : > { %s2332_s20 = scalar_select %p1869_p3, 1, 0 }
  0x1a   : > { %p1285_p4 = pneg %p1869_p3  ;;  %s1885_s27 = sshll.u32 %s1772_s26, 4  ;;  %s357_s27 = int_to_ptr.vmem [resolvable:$true] %s1885_s27 }
  0x1b   : > { %s2334_s2 = sld [smem:[#allocation29_spill]] }
  0x1c   : > { %p1879_p5 = pnand %p1285_p4, %p2318_p1 }
  0x1e   : > { %p1895_p7 = pneg %p1879_p5 }
  0x21   : > { %s1393_s30 = scalar_lea.hbm %s2334_s2, 64 }
  0x22   : > { %p1394_p6 = scmp.ne.s32.totalorder %s2334_s2, %s1393_s30  ;;  %p1400_p10 = scmp.lt.u32.totalorder %s1393_s30, %s2334_s2 }
  0x24   : > { %p1396_p8 = pnand %p1895_p7, %p1394_p6 }
  0x26   : > { %p1397_p9 = pneg %p1396_p8 }
  0x28   : > { %p1402_p11 = pnand %p1400_p10, %p1397_p9 }
  0x2a   : > { %1405 = shalt.err (!%p1402_p11)
}
  0x2b   : > { %s1406_s26 = scalar_lea.vmem %s1867_s18, 64  ;;  %p1414_p2 = scmp.lt.s32.totalorder %s1867_s18, %s1867_s18 }
  0x2c   : > { %p1407_p12 = scmp.ne.s32.totalorder %s1867_s18, %s1406_s26  ;;  %p1415_p4 = scmp.lt.s32.totalorder %s1406_s26, %s1406_s26 }
  0x2e   : > { %p1409_p13 = pnand %p1407_p12, %p1895_p7  ;;  %p1416_p6 = por %p1415_p4, %p1414_p2 }
  0x30   : > { %p1410_p0 = pneg %p1409_p13 }
  0x32   : > { %p1417_p8 = pnand %p1416_p6, %p1410_p0 }
  0x34   : > { %1420 = shalt.err (!%p1417_p8)
}
  0x35   : > { %1288 = dma.hbm_to_vmem [thread:$0]  (!%p1879_p5), %s2334_s2, 64, %s1867_s18, [#allocation6]  }
  0x36   : > { %s2336_s3 = sld [smem:[#allocation30_spill]] }
  0x3c   : > { %s1421_s12 = scalar_lea.hbm %s2336_s3, 16 }
  0x3d   : > { %p1422_p9 = scmp.ne.s32.totalorder %s2336_s3, %s1421_s12  ;;  %p1428_p12 = scmp.lt.u32.totalorder %s1421_s12, %s2336_s3 }
  0x3f   : > { %p1424_p10 = pnand %p1422_p9, %p1895_p7 }
  0x41   : > { %p1425_p11 = pneg %p1424_p10 }
  0x43   : > { %p1430_p13 = pnand %p1428_p12, %p1425_p11 }
  0x45   : > { %1433 = shalt.err (!%p1430_p13)
}
  0x46   : > { %s1434_s18 = scalar_lea.vmem %s1875_s22, 16  ;;  %s1441_s28 = scalar_lea.vmem %s1875_s22, 32 }
  0x47   : > { %p1435_p0 = scmp.ne.s32.totalorder %s1875_s22, %s1434_s18  ;;  %p1442_p6 = scmp.lt.s32.totalorder %s1875_s22, %s1875_s22 }
  0x48   : > { %p1443_p8 = scmp.lt.s32.totalorder %s1441_s28, %s1434_s18 }
  0x49   : > { %p1437_p2 = pnand %p1435_p0, %p1895_p7 }
  0x4a   : > { %p1444_p9 = por %p1443_p8, %p1442_p6 }
  0x4b   : > { %p1438_p4 = pneg %p1437_p2 }
  0x4d   : > { %p1445_p10 = pnand %p1444_p9, %p1438_p4 }
  0x4f   : > { %1448 = shalt.err (!%p1445_p10)
}
  0x50   : > { %1291 = dma.hbm_to_vmem [thread:$0]  (!%p1879_p5), %s2336_s3, 16, %s1875_s22, [#allocation9]  }
  0x51   : > { %s2337_s5 = sld [smem:[#allocation32_spill]] }
  0x57   : > { %s1449_s12 = scalar_lea.hbm %s2337_s5, 16 }
  0x58   : > { %p1450_p11 = scmp.ne.s32.totalorder %s2337_s5, %s1449_s12  ;;  %p1456_p0 = scmp.lt.u32.totalorder %s1449_s12, %s2337_s5 }
  0x5a   : > { %p1452_p12 = pnand %p1450_p11, %p1895_p7 }
  0x5c   : > { %p1453_p13 = pneg %p1452_p12 }
  0x5e   : > { %p1458_p2 = pnand %p1456_p0, %p1453_p13 }
  0x60   : > { %1461 = shalt.err (!%p1458_p2)
}
  0x61   : > { %s1462_s22 = scalar_lea.vmem %s1883_s24, 16  ;;  %s1469_s28 = scalar_lea.vmem %s1883_s24, 32 }
  0x62   : > { %p1463_p4 = scmp.ne.s32.totalorder %s1883_s24, %s1462_s22  ;;  %p1470_p9 = scmp.lt.s32.totalorder %s1883_s24, %s1883_s24 }
  0x63   : > { %p1471_p10 = scmp.lt.s32.totalorder %s1469_s28, %s1462_s22 }
  0x64   : > { %p1465_p6 = pnand %p1463_p4, %p1895_p7 }
  0x65   : > { %p1472_p11 = por %p1471_p10, %p1470_p9 }
  0x66   : > { %p1466_p8 = pneg %p1465_p6 }
  0x68   : > { %p1473_p12 = pnand %p1472_p11, %p1466_p8 }
  0x6a   : > { %1476 = shalt.err (!%p1473_p12)
}
  0x6b   : > { %1297 = dma.hbm_to_vmem [thread:$0]  (!%p1879_p5), %s2337_s5, 16, %s1883_s24, [#allocation12]  }
  0x6c   : > { %s1773_s30 = smov [#allocation10]   ;;  %s1477_s23 = scalar_lea.hbm %s2313_s7, 16 }
  0x6d   : > { %s318_s11 = sshll.u32 %s1773_s30, 4  ;;  %p1478_p13 = scmp.ne.s32.totalorder %s2313_s7, %s1477_s23  ;;  %s319_s11 = int_to_ptr.vmem [resolvable:$true] %s318_s11 }
  0x6e   : > { %p1484_p4 = scmp.lt.u32.totalorder %s1477_s23, %s2313_s7 }
  0x6f   : > { %p1480_p0 = pnand %p1478_p13, %p1895_p7 }
  0x71   : > { %p1481_p2 = pneg %p1480_p0 }
  0x73   : > { %p1486_p6 = pnand %p1484_p4, %p1481_p2 }
  0x75   : > { %1489 = shalt.err (!%p1486_p6)
}
  0x76   : > { %s1490_s24 = scalar_lea.vmem %s357_s27, 16  ;;  %s1497_s10 = scalar_lea.vmem %s357_s27, 32 }
  0x77   : > { %p1491_p8 = scmp.ne.s32.totalorder %s357_s27, %s1490_s24  ;;  %p1498_p11 = scmp.lt.s32.totalorder %s357_s27, %s357_s27 }
  0x78   : > { %p1499_p12 = scmp.lt.s32.totalorder %s1497_s10, %s1490_s24 }
  0x79   : > { %p1493_p9 = pnand %p1491_p8, %p1895_p7 }
  0x7a   : > { %p1500_p1 = por %p1499_p12, %p1498_p11 }
  0x7b   : > { %p1494_p10 = pneg %p1493_p9 }
  0x7d   : > { %p1501_p3 = pnand %p1500_p1, %p1494_p10 }
  0x7f   : > { %1504 = shalt.err (!%p1501_p3)
}
  0x80   : > { %1303 = dma.hbm_to_vmem [thread:$0]  (!%p1879_p5), %s2313_s7, 16, %s357_s27, [#allocation15]  }
  0x81   : > { %s2338_s4 = sld [smem:[#allocation31_spill]] }
  0x87   : > { %s1505_s23 = scalar_lea.hbm %s2338_s4, 256 }
  0x88   : > { %p1506_p13 = scmp.ne.s32.totalorder %s2338_s4, %s1505_s23  ;;  %p1512_p3 = scmp.lt.u32.totalorder %s1505_s23, %s2338_s4 }
  0x8a   : > { %p1508_p0 = pnand %p1506_p13, %p1895_p7 }
  0x8c   : > { %p1509_p1 = pneg %p1508_p0 }
  0x8e   : > { %p1514_p2 = pnand %p1512_p3, %p1509_p1 }
  0x90   : > { %1517 = shalt.err (!%p1514_p2)
}
  0x91   : > { %s1518_s24 = scalar_lea.vmem %s319_s11, 256  ;;  %p1526_p9 = scmp.lt.s32.totalorder %s319_s11, %s319_s11 }
  0x92   : > { %p1519_p4 = scmp.ne.s32.totalorder %s319_s11, %s1518_s24  ;;  %p1527_p10 = scmp.lt.s32.totalorder %s1518_s24, %s1518_s24 }
  0x94   : > { %p1521_p6 = pnand %p1519_p4, %p1895_p7  ;;  %p1528_p11 = por %p1527_p10, %p1526_p9 }
  0x96   : > { %p1522_p8 = pneg %p1521_p6 }
  0x98   : > { %p1529_p12 = pnand %p1528_p11, %p1522_p8 }
  0x9a   : > { %1532 = shalt.err (!%p1529_p12)
}
  0x9b   : > { %s2320_s27 = smov 64   ;;  %s2322_s10 = smov 4  }
  0x9c   : > { %1294 = dma.hbm_to_vmem [thread:$0]  (!%p1879_p5), %s2338_s4, 256, %s319_s11, [#allocation9], %s2320_s27, %s2320_s27, %s2322_s10  }
  0x9d   : > { %s1776_s12 = smov [#allocation13]   ;;  %s1777_s23 = smov [#allocation16]  }
  0x9e   : > { %s342_s21 = sshll.u32 %s1776_s12, 4  ;;  %s366_s26 = sshll.u32 %s1777_s23, 4  ;;  %s343_s21 = int_to_ptr.vmem [resolvable:$true] %s342_s21  ;;  %s367_s26 = int_to_ptr.vmem [resolvable:$true] %s366_s26 }
  0x9f   : > { %s2339_s6 = sld [smem:[#allocation33_spill]] }
  0xa5   : > { %s1533_s28 = scalar_lea.hbm %s2339_s6, 256 }
  0xa6   : > { %p1534_p13 = scmp.ne.s32.totalorder %s2339_s6, %s1533_s28  ;;  %p1540_p3 = scmp.lt.u32.totalorder %s1533_s28, %s2339_s6 }
  0xa8   : > { %p1536_p0 = pnand %p1534_p13, %p1895_p7 }
  0xaa   : > { %p1537_p1 = pneg %p1536_p0 }
  0xac   : > { %p1542_p2 = pnand %p1540_p3, %p1537_p1 }
  0xae   : > { %1545 = shalt.err (!%p1542_p2)
}
  0xaf   : > { %s1546_s11 = scalar_lea.vmem %s343_s21, 256  ;;  %p1554_p9 = scmp.lt.s32.totalorder %s343_s21, %s343_s21 }
  0xb0   : > { %p1547_p4 = scmp.ne.s32.totalorder %s343_s21, %s1546_s11  ;;  %p1555_p10 = scmp.lt.s32.totalorder %s1546_s11, %s1546_s11 }
  0xb2   : > { %p1549_p6 = pnand %p1547_p4, %p1895_p7  ;;  %p1556_p11 = por %p1555_p10, %p1554_p9 }
  0xb4   : > { %p1550_p8 = pneg %p1549_p6 }
  0xb6   : > { %p1557_p12 = pnand %p1556_p11, %p1550_p8 }
  0xb8   : > { %1560 = shalt.err (!%p1557_p12)
}
  0xb9   : > { %1300 = dma.hbm_to_vmem [thread:$0]  (!%p1879_p5), %s2339_s6, 256, %s343_s21, [#allocation12], %s2320_s27, %s2320_s27, %s2322_s10  }
  0xba   : > { %s1561_s30 = scalar_lea.hbm %s2314_s8, 256 }
  0xbb   : > { %p1562_p13 = scmp.ne.s32.totalorder %s2314_s8, %s1561_s30  ;;  %p1568_p3 = scmp.lt.u32.totalorder %s1561_s30, %s2314_s8 }
  0xbd   : > { %p1564_p0 = pnand %p1562_p13, %p1895_p7 }
  0xbf   : > { %p1565_p1 = pneg %p1564_p0 }
  0xc1   : > { %p1570_p2 = pnand %p1568_p3, %p1565_p1 }
  0xc3   : > { %1573 = shalt.err (!%p1570_p2)
}
  0xc4   : > { %s1574_s28 = scalar_lea.vmem %s367_s26, 256  ;;  %p1582_p9 = scmp.lt.s32.totalorder %s367_s26, %s367_s26 }
  0xc5   : > { %p1575_p4 = scmp.ne.s32.totalorder %s367_s26, %s1574_s28  ;;  %p1583_p10 = scmp.lt.s32.totalorder %s1574_s28, %s1574_s28 }
  0xc7   : > { %p1577_p6 = pnand %p1575_p4, %p1895_p7  ;;  %p1584_p11 = por %p1583_p10, %p1582_p9 }
  0xc9   : > { %p1578_p8 = pneg %p1577_p6 }
  0xcb   : > { %p1585_p12 = pnand %p1584_p11, %p1578_p8 }
  0xcd   : > { %1588 = shalt.err (!%p1585_p12)
}
  0xce   : > { %1306 = dma.hbm_to_vmem [thread:$0]  (!%p1879_p5), %s2314_s8, 256, %s367_s26, [#allocation15], %s2320_s27, %s2320_s27, %s2322_s10  }
  0xcf   : > { %s1778_s11 = smov [#allocation17]   ;;  %s1589_s29 = scalar_lea.hbm %s2315_s9, 16 }
  0xd0   : > { %s380_s2 = sshll.u32 %s1778_s11, 4  ;;  %p1590_p13 = scmp.ne.s32.totalorder %s2315_s9, %s1589_s29  ;;  %s381_s2 = int_to_ptr.vmem [resolvable:$true] %s380_s2 }
  0xd1   : > { %p1596_p3 = scmp.lt.u32.totalorder %s1589_s29, %s2315_s9 }
  0xd2   : > { %p1592_p0 = pnand %p1590_p13, %p1895_p7 }
  0xd4   : > { %p1593_p1 = pneg %p1592_p0 }
  0xd6   : > { %p1598_p2 = pnand %p1596_p3, %p1593_p1 }
  0xd8   : > { %1601 = shalt.err (!%p1598_p2)
}
  0xd9   : > { %s1602_s26 = scalar_lea.vmem %s381_s2, 16  ;;  %s1609_s22 = scalar_lea.vmem %s381_s2, 32 }
  0xda   : > { %p1603_p4 = scmp.ne.s32.totalorder %s381_s2, %s1602_s26  ;;  %p1610_p9 = scmp.lt.s32.totalorder %s381_s2, %s381_s2 }
  0xdb   : > { %p1611_p10 = scmp.lt.s32.totalorder %s1609_s22, %s1602_s26 }
  0xdc   : > { %p1605_p6 = pnand %p1603_p4, %p1895_p7 }
  0xdd   : > { %p1612_p11 = por %p1611_p10, %p1610_p9 }
  0xde   : > { %p1606_p8 = pneg %p1605_p6 }
  0xe0   : > { %p1613_p12 = pnand %p1612_p11, %p1606_p8 }
  0xe2   : > { %1616 = shalt.err (!%p1613_p12)
}
  0xe3   : > { %1309 = dma.hbm_to_vmem [thread:$0]  (!%p1879_p5), %s2315_s9, 16, %s381_s2, [#allocation18]  }
  0xe4   : > { %s1126_s17 = sadd.s32 4294967294, %s1767_s16   ;;  %s2066_s25 = sadd.s32 1, %s1767_s16  }
  0xe5   : > { %s37_s24 = ssub.s32 %s1767_s16, %s2066_s25  ;;  %s40_s11 = sadd.s32 1, %s1763_s15 }
  0xe6   : > { %p38_p7 = scmp.eq.s32.totalorder %s37_s24, 0  ;;  %p47_p13 = scmp.ne.s32.totalorder %s1763_s15, %s1759_s14 }
  0xe7   : > { %p48_p0 = scmp.eq.s32.totalorder %s1767_s16, 0  ;;  %p53_p1 = scmp.ne.s32.totalorder %s1759_s14, %s1755_s13 }
  0xe8   : > { %s2077_s3 = scalar_select %p38_p7, %s1763_s15, %s40_s11  }
  0xe9   : > { %p2079_p3 = por %p48_p0, %p47_p13  ;;  %p2341_p2 = scmp.eq.s32.totalorder %s1862_s19, 0 }
  0xea   : > { %p271_p4 = scmp.eq.s32.totalorder %s1862_s19, 3  ;;  %p277_p6 = scmp.eq.s32.totalorder %s1126_s17, 3 }
  0xeb   : > { %p2085_p5 = por %p2341_p2, %p53_p1  ;;  %p1329_p8 = scmp.lt.s32.totalorder %s1767_s16, 4 }
  0xec   : > { %s391_s29 = sand.u32 1, %s1763_s15   ;;  %p2092_p9 = por %p271_p4, %p47_p13 }
  0xed   : > { %p2096_p10 = por %p277_p6, %p53_p1  ;;  %s1137_s23 = sshll.u32 %s391_s29, 3 }
  0xee   : > { %s2343_s30 = scalar_select %p2092_p9, 1, 0 }
  0xef   : > { %s2344_s12 = scalar_select %p2096_p10, 1, 0 }
  0xf0   : > { %s1179_s18 = sshll.u32 %s1767_s16, 7  ;;  %s2345_s0 = sld [smem:[#allocation28_spill]] }
  0xf1   : > { %s395_s21 = scalar_lea.vmem [#allocation2], %s1137_s23  ;;  %p2110_p11 = pnand %p1329_p8, %p2079_p3 }
  0xf2   : > { %s402_s17 = sshll.u32 %s395_s21, 4  ;;  %s2117_s26 = scalar_lea.hbm %s2307_s1, %s1179_s18  ;;  %s2106_s17 = int_to_ptr.vmem [resolvable:$true] %s402_s17 }
  0xf3   : > { %s416_s22 = scalar_lea.vmem [#allocation5], %s1137_s23  ;;  %s2121_s4 = scalar_lea.sflag [#allocation3], %s391_s29 }
  0xf4   : > { %s2119_s10 = sshll.u32 %s416_s22, 4  ;;  %p1619_p7 = pneg %p2110_p11  ;;  %s2153_s10 = int_to_ptr.vmem [resolvable:$true] %s2119_s10 }
  0xf6   : > { %s2104_s28 = scalar_lea.hbm %s2345_s0, %s1179_s18  ;;  %s1622_s27 = scalar_lea.hbm %s2345_s0, 512 }
  0xf7   : > { %s1617_s21 = scalar_lea.hbm %s2104_s28, 128  ;;  %p1623_p1 = scmp.lt.u32.totalorder %s2104_s28, %s2345_s0 }
  0xf8   : > { %p1618_p12 = scmp.ne.s32.totalorder %s2104_s28, %s1617_s21  ;;  %p1624_p3 = scmp.lt.u32.totalorder %s1622_s27, %s1617_s21 }
  0xf9   : > { %p1626_p4 = scmp.lt.u32.totalorder %s1617_s21, %s2104_s28 }
  0xfa   : > { %p1620_p13 = pnand %p1619_p7, %p1618_p12  ;;  %p1625_p2 = por %p1624_p3, %p1623_p1 }
  0xfc   : > { %p1621_p0 = pneg %p1620_p13  ;;  %p1627_p6 = por %p1626_p4, %p1625_p2 }
  0xfe   : > { %p1628_p8 = pnand %p1627_p6, %p1621_p0 }
 0x100   : > { %1631 = shalt.err (!%p1628_p8)
}
 0x101   : > { %s1632_s29 = scalar_lea.vmem %s2106_s17, 128  ;;  %s1779_s6 = smov [#allocation2]  }
 0x102   : > { %p1633_p12 = scmp.ne.s32.totalorder %s2106_s17, %s1632_s29  ;;  %s1637_s23 = sshll.u32 %s1779_s6, 4  ;;  %s1638_s23 = int_to_ptr.vmem [resolvable:$false] %s1637_s23 }
 0x103   : > { %s1639_s22 = scalar_lea.vmem %s1638_s23, 256  ;;  %p1640_p9 = scmp.lt.s32.totalorder %s2106_s17, %s1638_s23 }
 0x104   : > { %p1635_p13 = pnand %p1633_p12, %p1619_p7  ;;  %p1641_p1 = scmp.lt.s32.totalorder %s1639_s22, %s1632_s29 }
 0x106   : > { %p1636_p10 = pneg %p1635_p13  ;;  %p1642_p3 = por %p1641_p1, %p1640_p9 }
 0x108   : > { %p1643_p2 = pnand %p1642_p3, %p1636_p10 }
 0x10a   : > { %1646 = shalt.err (!%p1643_p2)
}
 0x10b   : > { %s2347_s21 = smov 4   ;;  %s2348_s5 = smov 64  }
 0x10c   : > { %1313 = dma.hbm_to_vmem [thread:$0]  (!%p2110_p11), %s2104_s28, 128, %s2106_s17, %s2121_s4, %s2348_s5, %s2348_s5, %s2347_s21  }
 0x10d   : > { %s412_s27 = sand.u32 1, %s1767_s16   ;;  %s1647_s18 = scalar_lea.hbm %s2117_s26, 128 }
 0x10e   : > { %s2156_s11 = scalar_lea.sflag [#allocation6], %s412_s27  ;;  %p1648_p9 = scmp.ne.s32.totalorder %s2117_s26, %s1647_s18 }
 0x10f   : > { %s1652_s23 = scalar_lea.hbm %s2307_s1, 512  ;;  %p1653_p4 = scmp.lt.u32.totalorder %s2117_s26, %s2307_s1 }
 0x110   : > { %p1650_p10 = pnand %p1648_p9, %p1619_p7  ;;  %p1654_p6 = scmp.lt.u32.totalorder %s1652_s23, %s1647_s18 }
 0x111   : > { %p1656_p12 = scmp.lt.u32.totalorder %s1647_s18, %s2117_s26 }
 0x112   : > { %p1651_p0 = pneg %p1650_p10  ;;  %p1655_p8 = por %p1654_p6, %p1653_p4 }
 0x114   : > { %p1657_p13 = por %p1656_p12, %p1655_p8 }
 0x116   : > { %p1658_p1 = pnand %p1657_p13, %p1651_p0 }
 0x118   : > { %1661 = shalt.err (!%p1658_p1)
}
 0x119   : > { %s1662_s4 = scalar_lea.vmem %s2153_s10, 128  ;;  %s1780_s28 = smov [#allocation5]  }
 0x11a   : > { %p1663_p3 = scmp.ne.s32.totalorder %s2153_s10, %s1662_s4  ;;  %s1667_s17 = sshll.u32 %s1780_s28, 4  ;;  %s1668_s17 = int_to_ptr.vmem [resolvable:$false] %s1667_s17 }
 0x11b   : > { %s1669_s0 = scalar_lea.vmem %s1668_s17, 256  ;;  %p1670_p10 = scmp.lt.s32.totalorder %s2153_s10, %s1668_s17 }
 0x11c   : > { %p1665_p2 = pnand %p1663_p3, %p1619_p7  ;;  %p1671_p4 = scmp.lt.s32.totalorder %s1669_s0, %s1662_s4 }
 0x11e   : > { %p1666_p9 = pneg %p1665_p2  ;;  %p1672_p6 = por %p1671_p4, %p1670_p10 }
 0x120   : > { %p1673_p8 = pnand %p1672_p6, %p1666_p9 }
 0x122   : > { %1676 = shalt.err (!%p1673_p8)
}
 0x123   : > { %1316 = dma.hbm_to_vmem [thread:$0]  (!%p2110_p11), %s2117_s26, 128, %s2153_s10, %s2156_s11, %s2348_s5, %s2348_s5, %s2347_s21  }
 0x124   : > { %p2349_p7 = scmp.ne.s32.totalorder %s2332_s20, 0 }
 0x125   : > { %s2188_s27 = sand.u32 (!%p2349_p7), 1, %s1759_s14  }
 0x126   : > { %435 = sbr.rel (%p2349_p7) target bundleno = 1872 (0x750), region = 60  ;;  %s1144_s18 = sshll.u32 (!%p2349_p7), %s2188_s27, 3 }
 0x127   : > { %s438_s29 = scalar_lea.sflag (!%p2349_p7), [#allocation3], %s2188_s27  ;;  %s441_s6 = scalar_lea.vmem (!%p2349_p7), [#allocation2], %s1144_s18 }
 0x12d   : > { %1722 = dma.done.wait (%p2085_p5), %s438_s29, 128  }
 0x12e   : > { %1724 = vsyncadd (%p2085_p5), %s438_s29, 4294967168  ;;  %s446_s10 = sand.u32 1, %s1862_s19   ;;  %s450_s20 = scalar_lea.vmem [#allocation5], %s1144_s18 }
 0x12f   : > { %s447_s24 = scalar_lea.sflag [#allocation6], %s446_s10 }
 0x130   : > { %1726 = dma.done.wait (%p2085_p5), %s447_s24, 128  }
 0x131   : > { %1728 = vsyncadd (%p2085_p5), %s447_s24, 4294967168  ;;  %p2350_p11 = scmp.eq.s32.totalorder %s1862_s19, 0 }
 0x133   : > { %1730 = dma.done.wait (%p2350_p11), [#allocation6], 64   ;;  %p2351_p0 = pmov %p2350_p11 }
 0x135   : > { %1732 = vsyncadd (%p2351_p0), [#allocation6], 4294967232  ;;  %p2352_p12 = pmov %p2351_p0 }
 0x136   : > { %p2353_p13 = pmov %p2351_p0 }
 0x137   : > { %1734 = dma.done.wait (%p2352_p12), [#allocation9], 272  }
 0x138   : > { %1736 = vsyncadd (%p2353_p13), [#allocation9], 4294967024  ;;  %p2354_p1 = pmov %p2351_p0 }
 0x139   : > { %p2355_p3 = pmov %p2351_p0 }
 0x13a   : > { %1738 = dma.done.wait (%p2354_p1), [#allocation12], 272  }
 0x13b   : > { %1740 = vsyncadd (%p2355_p3), [#allocation12], 4294967024  ;;  %p2356_p5 = pmov %p2351_p0 }
 0x13c   : > { %p2357_p2 = pmov %p2351_p0 }
 0x13d   : > { %1742 = dma.done.wait (%p2356_p5), [#allocation15], 272  }
 0x13e   : > { %1744 = vsyncadd (%p2357_p2), [#allocation15], 4294967024  ;;  %p2358_p9 = pmov %p2351_p0 }
 0x13f   : > { %p2359_p10 = pmov %p2351_p0 }
 0x140   : > { %1746 = dma.done.wait (%p2358_p9), [#allocation18], 16  }
 0x141   : > { %1748 = vsyncadd (%p2359_p10), [#allocation18], 4294967280  ;;  %v1781_v0 = vmov 0.0   ;;  %vm1782_vm0 = vmmov 0   ;;  %v1385_v1 = vld [vmem:[%s450_s20] sm:$0xff]   ;;  %v2227_v2 = vld [vmem:[%s441_s6] sm:$0xff]  }
 0x142   : > { %1199 = vmatprep.subr.bf16.mxu0 %v1781_v0  ;;  %1201 = vmatprep.mubr.msk.bf16.mxu0 %vm1782_vm0, %v1781_v0  ;;  %vm544_vm1 = vcmask 130048   ;;  %v590_v3 = vld [vmem:[#allocation7] sm:$0xf]  ;;  %vm601_vm2 = vcmask 1043456   ;;  %vm597_vm3 = vcmask 64512   ;;  %v1387_v10 = vld [vmem:[#allocation10] sm:$0xff]  }
 0x143   : > { %1205 = vmatprep.subr.bf16.mxu1 %v1781_v0  ;;  %1207 = vmatprep.mubr.msk.bf16.mxu1 %vm1782_vm0, %v1781_v0  ;;  %v603_v4 = vsel %vm601_vm2, %v590_v3, 0  ;;  %v1388_v11 = vld [vmem:[#allocation10 + $0x8] sm:$0xff]   ;;  %v1158_v12 = vld [vmem:[#allocation8] ss:$0 sm:$0xff]  ;;  %vm665_vm4 = vcmask 261120   ;;  %v1389_v27 = vld [vmem:[#allocation13] sm:$0xff]  }
 0x144   : > { %1200 = vmatpush3.bf16.msra.mxu0 %v1385_v1  ;;  %1206 = vmatpush3.bf16.msra.mxu1 %v603_v4  ;;  %v1390_v28 = vld [vmem:[#allocation13 + $0x8] sm:$0xff]   ;;  %v1163_v29 = vld [vmem:[#allocation11] ss:$0 sm:$0xff]  ;;  %v1391_v44 = vld [vmem:[#allocation16] sm:$0xff]   ;;  %s1154_s2 = sshll.u32 %s2188_s27, 4  ;;  %s1181_s5 = sshll.u32 %s1862_s19, 8 }
 0x145   : > { %1211 = vmatprep.subr.bf16.mxu0 %v1781_v0  ;;  %1219 = vmatprep.subr.bf16.mxu1 %v1781_v0  ;;  %v1392_v45 = vld [vmem:[#allocation16 + $0x8] sm:$0xff]   ;;  %v1168_v46 = vld [vmem:[#allocation14] ss:$0 sm:$0xff]  ;;  %v1170_v56 = vld [vmem:[#allocation17] ss:$0 sm:$0xff]  ;;  %s523_s26 = scalar_lea.vmem [#allocation19], %s1154_s2 }
 0x146   : > { %s954_s21 = sshll.u32 %s523_s26, 4  ;;  %s2360_s22 = sld [smem:[#allocation34_spill]]  ;;  %s2258_s21 = int_to_ptr.vmem [resolvable:$true] %s954_s21 }
 0x147   : > { %1202 = vmatmul.mubr.msk.bf16.vlgmr.msra.gmra.mrb[0].mxu0 %vm544_vm1, %v2227_v2  ;;  %s941_s28 = scalar_lea.sflag [#allocation4], %s2188_s27  ;;  %s1677_s19 = scalar_lea.vmem %s2258_s21, 256 }
 0x148   : > { %1215 = vmatprep.mubr.msk.bf16.mxu0 %vm1782_vm0, %v1781_v0  ;;  %1212 = vmatpush3.bf16.msra.mxu0 %v1387_v10  ;;  %p1678_p4 = scmp.ne.s32.totalorder %s2258_s21, %s1677_s19  ;;  %p2361_p6 = scmp.ne.s32.totalorder %s2343_s30, 0 }
 0x149   : > { %1213 = vmatprep.subr.bf16.mxu0 %v1781_v0  ;;  %s1783_s17 = smov [#allocation19]  }
 0x14a   : > { %p1679_p8 = pnand %p1678_p4, %p2361_p6  ;;  %s1681_s0 = sshll.u32 %s1783_s17, 4  ;;  %s1682_s0 = int_to_ptr.vmem [resolvable:$false] %s1681_s0 }
 0x14b   : > { %s1683_s18 = scalar_lea.vmem %s1682_s0, 512  ;;  %p1684_p11 = scmp.lt.s32.totalorder %s2258_s21, %s1682_s0 }
 0x14c   : > { %1214 = vmatpush3.bf16.msra.mxu0 %v1388_v11  ;;  %s2263_s4 = scalar_lea.hbm %s2360_s22, %s1181_s5  ;;  %p1680_p7 = pneg %p1679_p8 }
 0x14d   : > { %1225 = vmatprep.subr.bf16.mxu0 %v1781_v0  ;;  %p1685_p0 = scmp.lt.s32.totalorder %s1683_s18, %s1677_s19 }
 0x14f   : > { %p1686_p12 = por %p1685_p0, %p1684_p11 }
 0x151   : > { %p1687_p13 = pnand %p1686_p12, %p1680_p7 }
 0x21a   : > { %v582_v5 = vpop.f32.mrb[0].mxu0 }
 0x21b   : > { %v1203_v6 = vpop.f32.mrb[1].mxu0 }
 0x21c   : > { %v585_v7 = vpop.f32.mrb[2].mxu0 }
 0x21d   : > { %v589_v8 = vpack.c.bf16 %v585_v7, %v582_v5  ;;  %v1204_v9 = vpop.f32.mrb[3].mxu0 }
 0x21f   : > { %1208 = vmatmul.mubr.msk.bf16.vlgmr.msra.gmra.mrb[0].mxu1 %vm597_vm3, %v589_v8 }
 0x220   : > { %1221 = vmatprep.mubr.msk.bf16.mxu1 %vm1782_vm0, %v1781_v0 }
 0x2f2   : > { %v639_v13 = vpop.f32.mrb[0].mxu1 }
 0x2f3   : > { %v640_v14 = vadd.f32 %v1158_v12, %v639_v13  ;;  %v1209_v15 = vpop.f32.mrb[1].mxu1 }
 0x2f4   : > { %v642_v16 = vpop.f32.mrb[2].mxu1 }
 0x2f5   : > { %v643_v17 = vadd.f32 %v1158_v12, %v642_v16  ;;  %v1210_v18 = vpop.f32.mrb[3].mxu1  ;;  %v646_v19 = vmax.f32 %v640_v14, 0.0 }
 0x2f7   : > { %v647_v20 = vmax.f32 %v643_v17, 0.0 }
 0x2f9   : > { %v648_v21 = vpack.c.bf16 %v647_v20, %v646_v19 }
 0x2fb   : > { %1216 = vmatmul.mubr.msk.bf16.vlgmr.msra.gmra.mrb[4].mxu0 %vm665_vm4, %v648_v21 }
 0x2fc   : > { %1229 = vmatprep.mubr.msk.bf16.mxu0 %vm1782_vm0, %v1781_v0  ;;  %1226 = vmatpush3.bf16.msra.mxu0 %v1389_v27 }
 0x2fd   : > { %1227 = vmatprep.subr.bf16.mxu0 %v1781_v0 }
 0x300   : > { %1228 = vmatpush3.bf16.msra.mxu0 %v1390_v28 }
 0x301   : > { %1239 = vmatprep.subr.bf16.mxu0 %v1781_v0 }
 0x3ce   : > { %v703_v22 = vpop.f32.mrb[4].mxu0 }
 0x3cf   : > { %v1217_v23 = vpop.f32.mrb[5].mxu0 }
 0x3d0   : > { %v706_v24 = vpop.f32.mrb[6].mxu0 }
 0x3d1   : > { %v710_v25 = vpack.c.bf16 %v706_v24, %v703_v22  ;;  %v1218_v26 = vpop.f32.mrb[7].mxu0 }
 0x3d3   : > { %1220 = vmatpush3.bf16.msra.mxu1 %v710_v25 }
 0x3d4   : > { %1233 = vmatprep.subr.bf16.mxu1 %v1781_v0 }
 0x3d6   : > { %1222 = vmatmul.mubr.msk.bf16.vlgmr.msra.gmra.mrb[4].mxu1 %vm544_vm1, %v2227_v2 }
 0x3d7   : > { %1235 = vmatprep.mubr.msk.bf16.mxu1 %vm1782_vm0, %v1781_v0 }
 0x4a9   : > { %v751_v30 = vpop.f32.mrb[4].mxu1 }
 0x4aa   : > { %v752_v31 = vadd.f32 %v1163_v29, %v751_v30  ;;  %v1223_v32 = vpop.f32.mrb[5].mxu1 }
 0x4ab   : > { %v754_v33 = vpop.f32.mrb[6].mxu1 }
 0x4ac   : > { %v755_v34 = vadd.f32 %v1163_v29, %v754_v33  ;;  %v1224_v35 = vpop.f32.mrb[7].mxu1  ;;  %v758_v36 = vmax.f32 %v752_v31, 0.0 }
 0x4ae   : > { %v759_v37 = vmax.f32 %v755_v34, 0.0 }
 0x4b0   : > { %v760_v38 = vpack.c.bf16 %v759_v37, %v758_v36 }
 0x4b2   : > { %1230 = vmatmul.mubr.msk.bf16.vlgmr.msra.gmra.mrb[8].mxu0 %vm665_vm4, %v760_v38 }
 0x4b3   : > { %1243 = vmatprep.mubr.msk.bf16.mxu0 %vm1782_vm0, %v1781_v0  ;;  %1240 = vmatpush3.bf16.msra.mxu0 %v1391_v44 }
 0x4b4   : > { %1241 = vmatprep.subr.bf16.mxu0 %v1781_v0 }
 0x4b7   : > { %1242 = vmatpush3.bf16.msra.mxu0 %v1392_v45 }
 0x585   : > { %v814_v39 = vpop.f32.mrb[8].mxu0 }
 0x586   : > { %v1231_v40 = vpop.f32.mrb[9].mxu0 }
 0x587   : > { %v817_v41 = vpop.f32.mrb[10].mxu0 }
 0x588   : > { %v821_v42 = vpack.c.bf16 %v817_v41, %v814_v39  ;;  %v1232_v43 = vpop.f32.mrb[11].mxu0 }
 0x58a   : > { %1234 = vmatpush3.bf16.msra.mxu1 %v821_v42 }
 0x58d   : > { %1236 = vmatmul.mubr.msk.bf16.vlgmr.msra.gmra.mrb[8].mxu1 %vm544_vm1, %v2227_v2 }
 0x660   : > { %v862_v47 = vpop.f32.mrb[8].mxu1 }
 0x661   : > { %v863_v48 = vadd.f32 %v1168_v46, %v862_v47  ;;  %v1237_v49 = vpop.f32.mrb[9].mxu1 }
 0x662   : > { %v865_v50 = vpop.f32.mrb[10].mxu1 }
 0x663   : > { %v866_v51 = vadd.f32 %v1168_v46, %v865_v50  ;;  %v1238_v52 = vpop.f32.mrb[11].mxu1  ;;  %v869_v53 = vmax.f32 %v863_v48, 0.0 }
 0x665   : > { %v870_v54 = vmax.f32 %v866_v51, 0.0 }
 0x667   : > { %v871_v55 = vpack.c.bf16 %v870_v54, %v869_v53 }
 0x669   : > { %1244 = vmatmul.mubr.msk.bf16.vlgmr.msra.gmra.mrb[12].mxu0 %vm665_vm4, %v871_v55 }
 0x73c   : > { %v931_v57 = vpop.f32.mrb[12].mxu0 }
 0x73d   : > { %v932_v58 = vadd.f32 %v1170_v56, %v931_v57  ;;  %v1245_v59 = vpop.f32.mrb[13].mxu0 }
 0x73e   : > { %v934_v60 = vpop.f32.mrb[14].mxu0 }
 0x73f   : > { %938 = vst [vmem:[%s523_s26] sm:$0xff] %v932_v58  ;;  %v935_v61 = vadd.f32 %v1170_v56, %v934_v60  ;;  %v1246_v62 = vpop.f32.mrb[15].mxu0 }
 0x741   : > { %939 = vst [vmem:[%s523_s26 + $0x8] sm:$0xff] %v935_v61 }
 0x742   : > { %1690 = shalt.err (!%p1687_p13)
}
 0x743   : > { %s1691_s29 = scalar_lea.hbm %s2263_s4, 256  ;;  %s1695_s24 = scalar_lea.hbm %s2360_s22, 1024 }
 0x744   : > { %p1692_p1 = scmp.ne.s32.totalorder %s2263_s4, %s1691_s29  ;;  %p1696_p2 = scmp.lt.u32.totalorder %s2263_s4, %s2360_s22 }
 0x745   : > { %p1697_p9 = scmp.lt.u32.totalorder %s1695_s24, %s1691_s29  ;;  %p1699_p4 = scmp.lt.u32.totalorder %s1691_s29, %s2263_s4 }
 0x746   : > { %p1693_p3 = pnand %p1692_p1, %p2361_p6 }
 0x747   : > { %p1698_p10 = por %p1697_p9, %p1696_p2 }
 0x748   : > { %p1694_p5 = pneg %p1693_p3 }
 0x749   : > { %p1700_p8 = por %p1699_p4, %p1698_p10 }
 0x74b   : > { %p1701_p7 = pnand %p1700_p8, %p1694_p5 }
 0x74d   : > { %1704 = shalt.err (!%p1701_p7)
}
 0x74e   : > { %s1784_s26 = smov 128   ;;  %s1785_s5 = smov 8  }
 0x74f   : > { %1283 = dma.vmem_to_hbm [thread:$0]  (%p2361_p6), %s2258_s21, 256, %s2263_s4, %s941_s28, %s1784_s26, %s1784_s26, %s1785_s5  }
 0x750 PF: > { %p1338_p11 = scmp.ge.s32.totalorder %s1767_s16, 2  ;;  %s969_s11 = sand.u32 1, %s1755_s13  }
 0x751   : > { %p2362_p0 = scmp.ne.s32.totalorder %s2344_s12, 0  ;;  %s970_s23 = scalar_lea.sflag [#allocation4], %s969_s11 }
 0x753   : > { %p1318_p12 = pnand %p1338_p11, %p2362_p0 }
 0x755   : > { %1750 = dma.done.wait (!%p1318_p12), %s970_s23, 256  }
 0x756   : > { %1752 = vsyncadd (!%p1318_p12), %s970_s23, 4294967040  ;;  %p30_p13 = scmp.ge.s32.totalorder %s2066_s25, 6   ;;  %s2363_s13 = smov %s1759_s14 }
 0x757   : > { %s2364_s14 = smov %s1763_s15  ;;  %s2365_s15 = smov %s2077_s3 }
 0x758   : > { %s2366_s16 = smov %s2066_s25  ;;  %32 = sbr.rel (!%p30_p13) target bundleno = 19 (0x13), region = 150 }
 0x75f   :  { %975 = vsyncpa [#allocation3], 1 }
 0x760   :  { %977 = vsyncpa [#allocation3 + $0x1], 1 }
 0x761   :  { %978 = vsyncpa [#allocation6], 1 }
 0x762   :  { %980 = vsyncpa [#allocation6 + $0x1], 1 }
 0x763   :  { %981 = vsyncpa [#allocation9], 1 }
 0x764   :  { %982 = vsyncpa [#allocation12], 1 }
 0x765   :  { %983 = vsyncpa [#allocation15], 1 }
 0x766   :  { %984 = vsyncpa [#allocation18], 1 }
 0x767   :  { %985 = vsyncpa [#allocation4], 1 }
 0x768   :  { %987 = vsyncpa [#allocation4 + $0x1], 1 }

</bundles_post_ra>
